<compile_context>
chip_gen: v7x
topology: tpu7x:2x2x1
jax: 0.10.0
libtpu: 0.0.40
codegen_flags: <defaults>
</compile_context>

<pallas_src>
import functools
from math import sqrt

import numpy as np
import jax
import jax.numpy as jnp
from jax import lax
from jax.experimental import pallas as pl
from jax.experimental.pallas import tpu as pltpu


def _silu_2mom_const() -> float:
    """normalize2mom(silu).cst = 1 / sqrt(E_{z~N(0,1)}[silu(z)^2]), deterministic quadrature."""
    z = np.linspace(-12.0, 12.0, 400001, dtype=np.float64)
    silu = z / (1.0 + np.exp(-z))
    pdf = np.exp(-0.5 * z * z) / np.sqrt(2.0 * np.pi)
    f = silu * silu * pdf
    second_moment = float(np.sum((f[1:] + f[:-1]) * 0.5 * np.diff(z)))
    return float(1.0 / np.sqrt(second_moment))


def _round_up(a: int, b: int) -> int:
    return ((a + b - 1) // b) * b


def _silu(h):
    # sigmoid(x) = 0.5*(1 + tanh(x/2)) -> transcendental on EUP, no VALU divide; exact math.
    return h * (0.5 * jnp.tanh(0.5 * h) + 0.5)


def exp_mlp_kernel(x_ref, w0t_ref, w1t_ref, w2t_ref, amp_ref, o_ref, *, out_features: int):
    # x tile arrives in its natural (tm, d0) layout; the batch->lanes transpose is folded
    # into the first matmul (contract both minor dims: W0^T @ x^T).  All hidden activations
    # are (features, tm): features (<=32) on sublanes, batch (multiple of 128) on lanes,
    # so every silu/tanh/exp is fully lane-dense.
    h = lax.dot_general(w0t_ref[...], x_ref[...],
                        dimension_numbers=(((1,), (1,)), ((), ())),
                        preferred_element_type=jnp.float32)              # (d1, tm)
    h = _silu(h)
    h = _silu(jnp.dot(w1t_ref[...], h, preferred_element_type=jnp.float32))
    h = jnp.dot(w2t_ref[...], h, preferred_element_type=jnp.float32)     # (2*out, tm)
    wts = h[:out_features, :]                     # exp-norm constant already folded into w2
    y = wts * jnp.exp(amp_ref[...] * jnp.tanh(h[out_features:, :]))      # (out, tm) lane-dense
    # Transpose back to the module's natural (batch, out) layout in-kernel (XLU is idle),
    # avoiding a separate XLA transpose pass over HBM.
    o_ref[...] = y.T.astype(o_ref.dtype)                                  # (tm, out)


def exponential_scalar_mlp(x, eff_weights, amplitude, *, out_features, exp_norm_const, tm=8192):
    """x: (N, D_in) f32. eff_weights: list of pre-scaled (h_in, h_out) f32 matrices (3 layers)."""
    N, d0 = x.shape
    w0, w1, w2 = eff_weights
    assert w2.shape[1] == 2 * out_features

    # Fold the exponential-function normalization constant into the 'weights' columns of the
    # last layer (exact: those outputs are linear in w2[:, :out]).
    col_scale = jnp.concatenate([jnp.full((out_features,), exp_norm_const, dtype=w2.dtype),
                                 jnp.ones((out_features,), dtype=w2.dtype)])
    w2 = w2 * col_scale

    w0t, w1t, w2t = w0.T, w1.T, w2.T                 # (h_out, h_in) for h^T = W^T @ h^T
    amp_col = amplitude.reshape(out_features, 1)     # broadcast over lanes (batch)

    # Tile selection: big lane tiles amortize the ~0.35us/step overhead; keep >=4 grid steps
    # (>=2 per v7x TensorCore) when that still leaves tiles >=2048 wide, else >=2 steps.
    tm_req = _round_up(max(int(tm), 128), 128)
    n128 = _round_up(N, 128)
    quarter = _round_up(pl.cdiv(n128, 4), 128)
    half = _round_up(pl.cdiv(n128, 2), 128)
    cap = quarter if quarter >= 2048 else max(128, half)
    tm_eff = min(tm_req, cap)
    grid_n = pl.cdiv(N, tm_eff)                      # ragged last block: masked store

    kernel = functools.partial(exp_mlp_kernel, out_features=out_features)

    out = pl.pallas_call(
        kernel,
        out_shape=jax.ShapeDtypeStruct((N, out_features), x.dtype),
        grid_spec=pltpu.PrefetchScalarGridSpec(
            num_scalar_prefetch=0,
            grid=(grid_n,),
            in_specs=[
                pl.BlockSpec((tm_eff, d0), lambda i: (i, 0)),          # natural-layout x tile
                pl.BlockSpec(w0t.shape, lambda i: (0, 0)),             # resident weights
                pl.BlockSpec(w1t.shape, lambda i: (0, 0)),
                pl.BlockSpec(w2t.shape, lambda i: (0, 0)),
                pl.BlockSpec((out_features, 1), lambda i: (0, 0)),     # amplitude column
            ],
            out_specs=pl.BlockSpec((tm_eff, out_features), lambda i: (i, 0)),  # natural layout
        ),
        compiler_params=pltpu.CompilerParams(dimension_semantics=("parallel",)),
    )(x, w0t, w1t, w2t, amp_col)

    return out                                        # (N, out_features), no extra HBM pass


def _reference(x, eff_weights, amplitude, out_features, exp_norm_const):
    h = x
    for li, w in enumerate(eff_weights):
        h = jnp.dot(h, w)
        if li < len(eff_weights) - 1:
            h = jax.nn.silu(h)
    wts = h[..., :out_features]
    exps = amplitude * jnp.tanh(h[..., out_features:])
    return wts * jnp.exp(exps) * exp_norm_const


if __name__ == "__main__":
    # Module config (small): mlp_input_dimension=32, mlp_latent_dimensions=[16, 16],
    # mlp_output_dimension=8  ->  internal dims = [32, 32, 32, 16], out_features = 8
    in_dim = 32
    latent = [16, 16]
    out_dim = 8
    exp_function_normalization_constant = 0.5

    dims = [in_dim] + [2 * d for d in latent] + [2 * out_dim]   # [32, 32, 32, 16]
    num_layers = len(dims) - 1
    nonlin_const = _silu_2mom_const()                            # normalize2mom(silu).cst

    key = jax.random.PRNGKey(0)
    key, xkey = jax.random.split(key)
    N = 256
    x = jax.random.normal(xkey, (N, in_dim), dtype=jnp.float32)

    # Deterministic parameter init: 'normal' init (standard normal), then fold in the
    # per-layer scale (norm_from_last / sqrt(h_in)) exactly as the fx-generated graph does.
    eff_weights = []
    norm_from_last = 1.0
    for layer, (h_in, h_out) in enumerate(zip(dims, dims[1:])):
        key, wkey = jax.random.split(key)
        w = jax.random.normal(wkey, (h_in, h_out), dtype=jnp.float32)
        eff_weights.append(w * (norm_from_last / sqrt(float(h_in))))
        if layer < num_layers - 1:
            norm_from_last = nonlin_const
    amplitude = jnp.ones((out_dim,), dtype=jnp.float32)          # _amplitude param init

    out = exponential_scalar_mlp(
        x, eff_weights, amplitude,
        out_features=out_dim,
        exp_norm_const=exp_function_normalization_constant,
        tm=8192,   # clamped internally: demo N=256 runs as 2 parallel 128-lane tiles
    )
    out = jax.block_until_ready(out)

    ref = _reference(x, eff_weights, amplitude, out_dim, exp_function_normalization_constant)
    np.testing.assert_allclose(np.asarray(out), np.asarray(ref), rtol=1e-4, atol=1e-4)

    print("KERNEL_OK")
</pallas_src>

<mosaic_0001>
module attributes {stable_mosaic.version = 11 : i64} {
  func.func @exp_mlp_kernel(%arg0: i32, %arg1: memref<128x32xf32, #tpu.memory_space<vmem>>, %arg2: memref<32x32xf32, #tpu.memory_space<vmem>>, %arg3: memref<32x32xf32, #tpu.memory_space<vmem>>, %arg4: memref<16x32xf32, #tpu.memory_space<vmem>>, %arg5: memref<8x1xf32, #tpu.memory_space<vmem>>, %arg6: memref<128x8xf32, #tpu.memory_space<vmem>>) attributes {dimension_semantics = [#tpu.dimension_semantics<parallel>], iteration_bounds = array<i64: 2>, scalar_prefetch = 0 : i64, scratch_operands = 0 : i64, tpu.core_type = #tpu.core_type<tc>, window_params = [{transform_indices = @transform_0, window_bounds = array<i64: 128, 32>}, {pipeline_mode = #tpu.pipeline_mode<synchronous>, transform_indices = @transform_1, window_bounds = array<i64: 32, 32>}, {pipeline_mode = #tpu.pipeline_mode<synchronous>, transform_indices = @transform_2, window_bounds = array<i64: 32, 32>}, {pipeline_mode = #tpu.pipeline_mode<synchronous>, transform_indices = @transform_3, window_bounds = array<i64: 16, 32>}, {pipeline_mode = #tpu.pipeline_mode<synchronous>, transform_indices = @transform_4, window_bounds = array<i64: 8, 1>}, {transform_indices = @transform_5, window_bounds = array<i64: 128, 8>}]} {
    %c0 = arith.constant 0 : index
    %c0_0 = arith.constant 0 : index
    %0 = vector.load %arg2[%c0, %c0_0] : memref<32x32xf32, #tpu.memory_space<vmem>>, vector<32x32xf32>
    %c0_1 = arith.constant 0 : index
    %c0_2 = arith.constant 0 : index
    %1 = vector.load %arg1[%c0_1, %c0_2] : memref<128x32xf32, #tpu.memory_space<vmem>>, vector<128x32xf32>
    %cst = arith.constant dense<0.000000e+00> : vector<32x128xf32>
    %2 = tpu.matmul %0, %1, %cst {dimension_numbers = #tpu.dot_dimension_numbers<[1], [1], [0], [0], [0, 0, 1, 0], [], []>} : vector<32x32xf32>, vector<128x32xf32>, vector<32x128xf32> -> vector<32x128xf32>
    %cst_3 = arith.constant 5.000000e-01 : f32
    %3 = vector.broadcast %cst_3 : f32 to vector<32x128xf32>
    %4 = arith.mulf %3, %2 : vector<32x128xf32>
    %5 = math.tanh %4 : vector<32x128xf32>
    %cst_4 = arith.constant 5.000000e-01 : f32
    %6 = vector.broadcast %cst_4 : f32 to vector<32x128xf32>
    %7 = arith.mulf %6, %5 : vector<32x128xf32>
    %cst_5 = arith.constant 5.000000e-01 : f32
    %8 = vector.broadcast %cst_5 : f32 to vector<32x128xf32>
    %9 = arith.addf %7, %8 : vector<32x128xf32>
    %10 = arith.mulf %2, %9 : vector<32x128xf32>
    %c0_6 = arith.constant 0 : index
    %c0_7 = arith.constant 0 : index
    %11 = vector.load %arg3[%c0_6, %c0_7] : memref<32x32xf32, #tpu.memory_space<vmem>>, vector<32x32xf32>
    %cst_8 = arith.constant dense<0.000000e+00> : vector<32x128xf32>
    %12 = tpu.matmul %11, %10, %cst_8 {dimension_numbers = #tpu.dot_dimension_numbers<[1], [0], [0], [1], [0, 0, 1, 1], [], []>} : vector<32x32xf32>, vector<32x128xf32>, vector<32x128xf32> -> vector<32x128xf32>
    %cst_9 = arith.constant 5.000000e-01 : f32
    %13 = vector.broadcast %cst_9 : f32 to vector<32x128xf32>
    %14 = arith.mulf %13, %12 : vector<32x128xf32>
    %15 = math.tanh %14 : vector<32x128xf32>
    %cst_10 = arith.constant 5.000000e-01 : f32
    %16 = vector.broadcast %cst_10 : f32 to vector<32x128xf32>
    %17 = arith.mulf %16, %15 : vector<32x128xf32>
    %cst_11 = arith.constant 5.000000e-01 : f32
    %18 = vector.broadcast %cst_11 : f32 to vector<32x128xf32>
    %19 = arith.addf %17, %18 : vector<32x128xf32>
    %20 = arith.mulf %12, %19 : vector<32x128xf32>
    %c0_12 = arith.constant 0 : index
    %c0_13 = arith.constant 0 : index
    %21 = vector.load %arg4[%c0_12, %c0_13] : memref<16x32xf32, #tpu.memory_space<vmem>>, vector<16x32xf32>
    %cst_14 = arith.constant dense<0.000000e+00> : vector<16x128xf32>
    %22 = tpu.matmul %21, %20, %cst_14 {dimension_numbers = #tpu.dot_dimension_numbers<[1], [0], [0], [1], [0, 0, 1, 1], [], []>} : vector<16x32xf32>, vector<32x128xf32>, vector<16x128xf32> -> vector<16x128xf32>
    %23 = vector.extract_strided_slice %22 {offsets = [0, 0], sizes = [8, 128], strides = [1, 1]} : vector<16x128xf32> to vector<8x128xf32>
    %c0_15 = arith.constant 0 : index
    %c0_16 = arith.constant 0 : index
    %24 = vector.load %arg5[%c0_15, %c0_16] : memref<8x1xf32, #tpu.memory_space<vmem>>, vector<8x1xf32>
    %25 = vector.extract_strided_slice %22 {offsets = [8, 0], sizes = [8, 128], strides = [1, 1]} : vector<16x128xf32> to vector<8x128xf32>
    %26 = math.tanh %25 : vector<8x128xf32>
    %27 = vector.broadcast %24 : vector<8x1xf32> to vector<8x128xf32>
    %28 = arith.mulf %27, %26 : vector<8x128xf32>
    %29 = math.exp %28 : vector<8x128xf32>
    %30 = arith.mulf %23, %29 : vector<8x128xf32>
    %31 = tpu.transpose %30, [1, 0] : vector<8x128xf32> -> vector<128x8xf32>
    %c0_17 = arith.constant 0 : index
    %c0_18 = arith.constant 0 : index
    %32 = vector.load %arg6[%c0_17, %c0_18] : memref<128x8xf32, #tpu.memory_space<vmem>>, vector<128x8xf32>
    tpu.vector_store %arg6[%c0_17, %c0_18], %31 {strides = array<i32>} : memref<128x8xf32, #tpu.memory_space<vmem>>, vector<128x8xf32>,
    return
  }
  func.func @transform_0(%arg0: i32) -> (i32, i32) {
    %c0_i32 = arith.constant 0 : i32
    %c0_i32_0 = arith.constant 0 : i32
    return %arg0, %c0_i32 : i32, i32
  }
  func.func @transform_1(%arg0: i32) -> (i32, i32) {
    %c0_i32 = arith.constant 0 : i32
    %c0_i32_0 = arith.constant 0 : i32
    %c0_i32_1 = arith.constant 0 : i32
    return %c0_i32, %c0_i32_0 : i32, i32
  }
  func.func @transform_2(%arg0: i32) -> (i32, i32) {
    %c0_i32 = arith.constant 0 : i32
    %c0_i32_0 = arith.constant 0 : i32
    %c0_i32_1 = arith.constant 0 : i32
    return %c0_i32, %c0_i32_0 : i32, i32
  }
  func.func @transform_3(%arg0: i32) -> (i32, i32) {
    %c0_i32 = arith.constant 0 : i32
    %c0_i32_0 = arith.constant 0 : i32
    %c0_i32_1 = arith.constant 0 : i32
    return %c0_i32, %c0_i32_0 : i32, i32
  }
  func.func @transform_4(%arg0: i32) -> (i32, i32) {
    %c0_i32 = arith.constant 0 : i32
    %c0_i32_0 = arith.constant 0 : i32
    %c0_i32_1 = arith.constant 0 : i32
    return %c0_i32, %c0_i32_0 : i32, i32
  }
  func.func @transform_5(%arg0: i32) -> (i32, i32) {
    %c0_i32 = arith.constant 0 : i32
    %c0_i32_0 = arith.constant 0 : i32
    return %arg0, %c0_i32 : i32, i32
  }
}

</mosaic_0001>

<bundles_post_ra>
// kernel: tpu_custom_call.1
= control target key start
LH: loop header
LB: loop body
LE: loop exit
PB: predicated region body
PF: predicated region fallthrough
CT: control target
= control target key end

     0   :  { %s1002_s18 = smov 0   ;;  %s1159_s0 = inlined_call_operand.vmem [shape: f32[256,32], index: 0, kind: input, shape index: {}]   ;;  %s1160_s1 = inlined_call_operand.vmem [shape: f32[32,32], index: 1, kind: input, shape index: {}]   ;;  %s1161_s2 = inlined_call_operand.vmem [shape: f32[32,32], index: 2, kind: input, shape index: {}]   ;;  %s1162_s3 = inlined_call_operand.vmem [shape: f32[16,32], index: 3, kind: input, shape index: {}]   ;;  %s1163_s4 = inlined_call_operand.vmem [shape: f32[8,1], index: 4, kind: input, shape index: {}]   ;;  %s1164_s5 = inlined_call_operand.vmem [shape: f32[256,8], index: 5, kind: output, shape index: {}]  }
   0x1 LB: > { %s734_s19 = sadd.s32 4294967295, %s969_s18   ;;  %p738_p0 = scmp.ge.s32.totalorder %s969_s18, 1  ;;  %s969_s18 = sphi %s1002_s18, %s15_s18  }
   0x2   : > { %p188_p1 = scmp.lt.s32.totalorder %s969_s18, 3 }
   0x4   : > { %p189_p2 = pnand %p738_p0, %p188_p1 }
   0x5   : > { %s739_s20 = sshll.u32 (!%p189_p2), %s734_s19, 4  ;;  %vm248_vm0 = vcmask (!%p189_p2), 261120   ;;  %v228_v0 = vld [vmem:[%s1160_s1] sm:$0xff] (!%p189_p2)  ;;  %v229_v26 = vld [vmem:[%s1160_s1 + $0x8] sm:$0xff] (!%p189_p2)  ;;  %v230_v27 = vld [vmem:[%s1160_s1 + $0x10] sm:$0xff] (!%p189_p2)  ;;  %v971_v61 = vmov (!%p189_p2), 0  }
   0x6   : > { %192 = sbr.rel (%p189_p2) target bundleno = 997 (0x3e5), region = 40  ;;  %p217_p3 = scmp.lt.s32.totalorder (!%p189_p2), %s739_s20, 31  ;;  %837 = vmatprep.mubr.msk.f32.mxu0 (!%p189_p2), %vm248_vm0, %v228_v0  ;;  %vm1026_vm1 = vmpackc.low (!%p189_p2), %vm248_vm0, %vm248_vm0  ;;  %v231_v28 = vld [vmem:[%s1160_s1 + $0x18] sm:$0xff] (!%p189_p2)  ;;  %v414_v29 = vld [vmem:[%s1161_s2] sm:$0xff] (!%p189_p2)  ;;  %942 = vset.pattern.permute.xlu0 (!%p189_p2), %v971_v61  ;;  %vm661_vm2 = vcmask (!%p189_p2), 64512  }
   0x7   : > { %851 = vmatprep.mubr.msk.f32.mxu1 (!%p189_p2), %vm248_vm0, %v414_v29  ;;  %v415_v56 = vld [vmem:[%s1161_s2 + $0x8] sm:$0xff] (!%p189_p2)  ;;  %v416_v57 = vld [vmem:[%s1161_s2 + $0x10] sm:$0xff] (!%p189_p2)  ;;  %v417_v58 = vld [vmem:[%s1161_s2 + $0x18] sm:$0xff] (!%p189_p2) }
   0x8   : > { %v535_v59 = vld [vmem:[%s1162_s3] sm:$0xff] (!%p189_p2) }
   0x9   : > { %v618_v60 = vld [vmem:[%s1163_s4] sm:$0xff] (!%p189_p2) }
   0xa   : > { %622 = vperm.xlu0 (!%p189_p2), %942, %v618_v60  }
   0xd   : > { %s1168_s20 = smov (!%p217_p3, %s739_s20), 31 }
   0xe   : > { %s740_s23 = sshll.u32 %s1168_s20, 3 }
   0xf   : > { %s1022_s26 = scalar_lea.vmem %s1159_s0, %s740_s23  ;;  %s1122_s27 = scalar_lea.vmem %s1164_s5, %s740_s23 }
  0x10   : > { %v232_v2 = vld [vmem:[%s1022_s26] sm:$0xff]  ;;  %v233_v3 = vld [vmem:[%s1022_s26 + $0x8] sm:$0xff]  ;;  %v234_v4 = vld [vmem:[%s1022_s26 + $0x10] sm:$0xff] }
  0x11   : > { %v868_v5 = vpack.c.bf16 %v233_v3, %v232_v2  ;;  %v235_v6 = vld [vmem:[%s1022_s26 + $0x18] sm:$0xff]  ;;  %v236_v8 = vld [vmem:[%s1022_s26 + $0x20] sm:$0xff]  ;;  %v237_v9 = vld [vmem:[%s1022_s26 + $0x28] sm:$0xff] }
  0x12   : > { %v874_v7 = vpack.c.bf16 %v235_v6, %v234_v4  ;;  %v880_v10 = vpack.c.bf16 %v237_v9, %v236_v8  ;;  %v238_v11 = vld [vmem:[%s1022_s26 + $0x30] sm:$0xff]  ;;  %v239_v12 = vld [vmem:[%s1022_s26 + $0x38] sm:$0xff]  ;;  %v240_v14 = vld [vmem:[%s1022_s26 + $0x40] sm:$0xff] }
  0x13   : > { %870 = vmatprep.subr.msk.bf16.mxu0 %vm1026_vm1, %v868_v5  ;;  %v886_v13 = vpack.c.bf16 %v239_v12, %v238_v11  ;;  %v241_v15 = vld [vmem:[%s1022_s26 + $0x48] sm:$0xff]  ;;  %v242_v17 = vld [vmem:[%s1022_s26 + $0x50] sm:$0xff]  ;;  %v243_v18 = vld [vmem:[%s1022_s26 + $0x58] sm:$0xff] }
  0x14   : > { %873 = vmatpush3.bf16.xpose.msk.msra.mxu0 %vm1026_vm1, %v868_v5  ;;  %v892_v16 = vpack.c.bf16 %v241_v15, %v240_v14  ;;  %v898_v19 = vpack.c.bf16 %v243_v18, %v242_v17  ;;  %v244_v20 = vld [vmem:[%s1022_s26 + $0x60] sm:$0xff]  ;;  %v245_v21 = vld [vmem:[%s1022_s26 + $0x68] sm:$0xff]  ;;  %v246_v23 = vld [vmem:[%s1022_s26 + $0x70] sm:$0xff] }
  0x15   : > { %876 = vmatprep.subr.msk.bf16.mxu0 %vm1026_vm1, %v874_v7  ;;  %v904_v22 = vpack.c.bf16 %v245_v21, %v244_v20  ;;  %v247_v24 = vld [vmem:[%s1022_s26 + $0x78] sm:$0xff] }
  0x16   : > { %v910_v25 = vpack.c.bf16 %v247_v24, %v246_v23  ;;  %v536_v24 = vld [vmem:[%s1162_s3 + $0x8] sm:$0xff] }
  0x1c   : > { %879 = vmatpush3.bf16.xpose.msk.msra.mxu0 %vm1026_vm1, %v874_v7 }
  0x1d   : > { %882 = vmatprep.subr.msk.bf16.mxu0 %vm1026_vm1, %v880_v10 }
  0x24   : > { %885 = vmatpush3.bf16.xpose.msk.msra.mxu0 %vm1026_vm1, %v880_v10 }
  0x25   : > { %888 = vmatprep.subr.msk.bf16.mxu0 %vm1026_vm1, %v886_v13 }
  0x2c   : > { %891 = vmatpush3.bf16.xpose.msk.msra.mxu0 %vm1026_vm1, %v886_v13 }
  0x2d   : > { %894 = vmatprep.subr.msk.bf16.mxu0 %vm1026_vm1, %v892_v16 }
  0x34   : > { %897 = vmatpush3.bf16.xpose.msk.msra.mxu0 %vm1026_vm1, %v892_v16 }
  0x35   : > { %900 = vmatprep.subr.msk.bf16.mxu0 %vm1026_vm1, %v898_v19 }
  0x3c   : > { %903 = vmatpush3.bf16.xpose.msk.msra.mxu0 %vm1026_vm1, %v898_v19 }
  0x3d   : > { %906 = vmatprep.subr.msk.bf16.mxu0 %vm1026_vm1, %v904_v22 }
  0x44   : > { %909 = vmatpush3.bf16.xpose.msk.msra.mxu0 %vm1026_vm1, %v904_v22 }
  0x45   : > { %912 = vmatprep.subr.msk.bf16.mxu0 %vm1026_vm1, %v910_v25 }
  0x4c   : > { %915 = vmatpush3.bf16.xpose.msk.msra.mxu0 %vm1026_vm1, %v910_v25 }
  0x53   : > { %838 = vmatmul.mubr.msk.f32.vlgmr.msra.gmra.mrb[0].mxu0 %vm248_vm0, %v229_v26 }
  0x54   : > { %840 = vmatprep.mubr.msk.f32.mxu0 %vm248_vm0, %v230_v27 }
  0x57   : > { %841 = vmatmul.mubr.msk.f32.gmra.mrb[2].mxu0 %vm248_vm0, %v231_v28 }
  0x89   : > { %v623_v27 = vpop.permute.xlu0 %622 }
 0x126   : > { %v839_v30 = vpop.f32.mrb[0].mxu0 }
 0x127   : > { %v395_v31 = vmul.f32 0.5, %v839_v30  ;;  %v375_v32 = vpop.f32.mrb[1].mxu0 }
 0x128   : > { %v394_v33 = vmul.f32 0.5, %v375_v32 }
 0x129   : > { %943 = vtanh.f32 %v395_v31 }
 0x12a   : > { %945 = vtanh.f32 %v394_v33  ;;  %v842_v34 = vpop.f32.mrb[2].mxu0 }
 0x12b   : > { %v397_v35 = vmul.f32 0.5, %v842_v34  ;;  %v385_v36 = vpop.f32.mrb[3].mxu0 }
 0x12c   : > { %v396_v37 = vmul.f32 0.5, %v385_v36 }
 0x12d   : > { %947 = vtanh.f32 %v397_v35 }
 0x12e   : > { %949 = vtanh.f32 %v396_v37 }
 0x133   : > { %v944_v38 = vpop.eup %943 }
 0x134   : > { %v946_v39 = vpop.eup %945  ;;  %v403_v40 = vmul.f32 0.5, %v944_v38 }
 0x135   : > { %v402_v41 = vmul.f32 0.5, %v946_v39 }
 0x136   : > { %v407_v42 = vadd.f32 0.5, %v403_v40 }
 0x137   : > { %v948_v43 = vpop.eup %947  ;;  %v406_v44 = vadd.f32 0.5, %v402_v41 }
 0x138   : > { %v950_v45 = vpop.eup %949  ;;  %v411_v46 = vmul.f32 %v839_v30, %v407_v42  ;;  %v405_v47 = vmul.f32 0.5, %v948_v43 }
 0x139   : > { %v410_v48 = vmul.f32 %v406_v44, %v375_v32  ;;  %v404_v49 = vmul.f32 0.5, %v950_v45 }
 0x13a   : > { %v409_v50 = vadd.f32 0.5, %v405_v47 }
 0x13b   : > { %v408_v51 = vadd.f32 0.5, %v404_v49  ;;  %v916_v52 = vpack.c.bf16 %v411_v46, %v410_v48 }
 0x13c   : > { %v413_v53 = vmul.f32 %v842_v34, %v409_v50 }
 0x13d   : > { %v412_v54 = vmul.f32 %v408_v51, %v385_v36  ;;  %917 = vmatprep.subr.bf16.mxu1 %v916_v52 }
 0x13e   : > { %919 = vmatpush3.bf16.msra.mxu1 %v916_v52 }
 0x13f   : > { %v920_v55 = vpack.c.bf16 %v413_v53, %v412_v54 }
 0x141   : > { %921 = vmatprep.subr.bf16.mxu1 %v920_v55 }
 0x142   : > { %923 = vmatpush3.bf16.msra.mxu1 %v920_v55 }
 0x145   : > { %852 = vmatmul.mubr.msk.f32.vlgmr.msra.gmra.mrb[0].mxu1 %vm248_vm0, %v415_v56 }
 0x146   : > { %854 = vmatprep.mubr.msk.f32.mxu1 %vm248_vm0, %v416_v57 }
 0x149   : > { %855 = vmatmul.mubr.msk.f32.gmra.mrb[2].mxu1 %vm248_vm0, %v417_v58 }
 0x14a   : > { %865 = vmatprep.mubr.msk.f32.mxu1 %vm248_vm0, %v535_v59 }
 0x218   : > { %v853_v62 = vpop.f32.mrb[0].mxu1 }
 0x219   : > { %v516_v63 = vmul.f32 0.5, %v853_v62  ;;  %v496_v0 = vpop.f32.mrb[1].mxu1 }
 0x21a   : > { %v515_v1 = vmul.f32 0.5, %v496_v0 }
 0x21b   : > { %951 = vtanh.f32 %v516_v63 }
 0x21c   : > { %953 = vtanh.f32 %v515_v1  ;;  %v856_v2 = vpop.f32.mrb[2].mxu1 }
 0x21d   : > { %v518_v3 = vmul.f32 0.5, %v856_v2  ;;  %v506_v4 = vpop.f32.mrb[3].mxu1 }
 0x21e   : > { %v517_v5 = vmul.f32 0.5, %v506_v4 }
 0x21f   : > { %955 = vtanh.f32 %v518_v3 }
 0x220   : > { %957 = vtanh.f32 %v517_v5 }
 0x225   : > { %v952_v6 = vpop.eup %951 }
 0x226   : > { %v954_v7 = vpop.eup %953  ;;  %v524_v8 = vmul.f32 0.5, %v952_v6 }
 0x227   : > { %v523_v9 = vmul.f32 0.5, %v954_v7 }
 0x228   : > { %v528_v10 = vadd.f32 0.5, %v524_v8 }
 0x229   : > { %v956_v11 = vpop.eup %955  ;;  %v527_v12 = vadd.f32 0.5, %v523_v9 }
 0x22a   : > { %v958_v13 = vpop.eup %957  ;;  %v532_v14 = vmul.f32 %v853_v62, %v528_v10  ;;  %v526_v15 = vmul.f32 0.5, %v956_v11 }
 0x22b   : > { %v531_v16 = vmul.f32 %v527_v12, %v496_v0  ;;  %v525_v17 = vmul.f32 0.5, %v958_v13 }
 0x22c   : > { %v530_v18 = vadd.f32 0.5, %v526_v15 }
 0x22d   : > { %v924_v19 = vpack.c.bf16 %v532_v14, %v531_v16  ;;  %v529_v20 = vadd.f32 0.5, %v525_v17 }
 0x22e   : > { %v534_v21 = vmul.f32 %v856_v2, %v530_v18 }
 0x22f   : > { %v533_v22 = vmul.f32 %v529_v20, %v506_v4  ;;  %925 = vmatprep.subr.bf16.mxu1 %v924_v19 }
 0x230   : > { %927 = vmatpush3.bf16.msra.mxu1 %v924_v19 }
 0x231   : > { %v928_v23 = vpack.c.bf16 %v534_v21, %v533_v22 }
 0x233   : > { %929 = vmatprep.subr.bf16.mxu1 %v928_v23 }
 0x234   : > { %931 = vmatpush3.bf16.msra.mxu1 %v928_v23 }
 0x237   : > { %866 = vmatmul.mubr.msk.f32.vlgmr.msra.gmra.mrb[4].mxu1 %vm248_vm0, %v536_v24 }
 0x30a   : > { %v867_v25 = vpop.f32.mrb[4].mxu1 }
 0x30b   : > { %959 = vtanh.f32 %v867_v25  ;;  %v609_v26 = vpop.f32.mrb[5].mxu1 }
 0x315   : > { %v960_v28 = vpop.eup %959 }
 0x316   : > { %v625_v29 = vmul.f32 %v960_v28, %v623_v27 }
 0x318   : > { %v626_v30 = vmul.f32 1.442695, %v625_v29 }
 0x31a   : > { %961 = vpow2.f32 %v626_v30 }
 0x324   : > { %v962_v31 = vpop.eup %961 }
 0x325   : > { %v628_v32 = vmul.f32 %v962_v31, %v609_v26 }
 0x327   : > { %629 = vxpose.xlu0.b32.start.end [1/1] (short) %v628_v32, 128 }
 0x3a7   : > { %v645_v33 = vpop.trf.xlu0 }
 0x3a8   : > { %662 = vst.msk [vmem:[%s1122_s27] sm:$0xff] %vm661_vm2, %v645_v33 }
 0x3ab   : > { %v646_v34 = vpop.trf.xlu0 }
 0x3ac   : > { %663 = vst.msk [vmem:[%s1122_s27 + $0x8] sm:$0xff] %vm661_vm2, %v646_v34 }
 0x3af   : > { %v647_v35 = vpop.trf.xlu0 }
 0x3b0   : > { %664 = vst.msk [vmem:[%s1122_s27 + $0x10] sm:$0xff] %vm661_vm2, %v647_v35 }
 0x3b3   : > { %v648_v36 = vpop.trf.xlu0 }
 0x3b4   : > { %665 = vst.msk [vmem:[%s1122_s27 + $0x18] sm:$0xff] %vm661_vm2, %v648_v36 }
 0x3b7   : > { %v649_v37 = vpop.trf.xlu0 }
 0x3b8   : > { %666 = vst.msk [vmem:[%s1122_s27 + $0x20] sm:$0xff] %vm661_vm2, %v649_v37 }
 0x3bb   : > { %v650_v38 = vpop.trf.xlu0 }
 0x3bc   : > { %667 = vst.msk [vmem:[%s1122_s27 + $0x28] sm:$0xff] %vm661_vm2, %v650_v38 }
 0x3bf   : > { %v651_v39 = vpop.trf.xlu0 }
 0x3c0   : > { %668 = vst.msk [vmem:[%s1122_s27 + $0x30] sm:$0xff] %vm661_vm2, %v651_v39 }
 0x3c3   : > { %v652_v40 = vpop.trf.xlu0 }
 0x3c4   : > { %669 = vst.msk [vmem:[%s1122_s27 + $0x38] sm:$0xff] %vm661_vm2, %v652_v40 }
 0x3c7   : > { %v653_v41 = vpop.trf.xlu0 }
 0x3c8   : > { %670 = vst.msk [vmem:[%s1122_s27 + $0x40] sm:$0xff] %vm661_vm2, %v653_v41 }
 0x3cb   : > { %v654_v42 = vpop.trf.xlu0 }
 0x3cc   : > { %671 = vst.msk [vmem:[%s1122_s27 + $0x48] sm:$0xff] %vm661_vm2, %v654_v42 }
 0x3cf   : > { %v655_v43 = vpop.trf.xlu0 }
 0x3d0   : > { %672 = vst.msk [vmem:[%s1122_s27 + $0x50] sm:$0xff] %vm661_vm2, %v655_v43 }
 0x3d3   : > { %v656_v44 = vpop.trf.xlu0 }
 0x3d4   : > { %673 = vst.msk [vmem:[%s1122_s27 + $0x58] sm:$0xff] %vm661_vm2, %v656_v44 }
 0x3d7   : > { %v657_v45 = vpop.trf.xlu0 }
 0x3d8   : > { %674 = vst.msk [vmem:[%s1122_s27 + $0x60] sm:$0xff] %vm661_vm2, %v657_v45 }
 0x3db   : > { %v658_v46 = vpop.trf.xlu0 }
 0x3dc   : > { %675 = vst.msk [vmem:[%s1122_s27 + $0x68] sm:$0xff] %vm661_vm2, %v658_v46 }
 0x3df   : > { %v659_v47 = vpop.trf.xlu0 }
 0x3e0   : > { %676 = vst.msk [vmem:[%s1122_s27 + $0x70] sm:$0xff] %vm661_vm2, %v659_v47 }
 0x3e3   : > { %v660_v48 = vpop.trf.xlu0 }
 0x3e4   : > { %677 = vst.msk [vmem:[%s1122_s27 + $0x78] sm:$0xff] %vm661_vm2, %v660_v48 }
 0x3e5 PF: > { %s15_s18 = sadd.s32 1, %s969_s18  }
 0x3e6   : > { %p12_p4 = scmp.ge.s32.totalorder %s15_s18, 4  }
 0x3e8   :  { %14 = sbr.rel (!%p12_p4) target bundleno = 1 (0x1), region = 70 }

</bundles_post_ra>
